<compile_context>
chip_gen: v7x
topology: tpu7x:2x2x1
jax: 0.10.0
libtpu: 0.0.40
codegen_flags: <defaults>
</compile_context>

<pallas_src>
import functools

import jax
import jax.numpy as jnp
import numpy as np
from jax.experimental import pallas as pl
from jax.experimental.pallas import tpu as pltpu


def _conv_tile(x, halo_ref, w_ref):
    """3-tap conv (padding=1) on one (C, Lt) tile.

    x        : (C, Lt) tile (already loaded from VMEM).
    halo_ref : (C, 2) block; column 0 = x[:, tile_start-1], column 1 = x[:, tile_end],
               zero at the sequence ends, so results are exact across tile boundaries.
    w_ref    : (3, C, C) stacked tap weights [w_prev, w_mid, w_next].

    Uses pltpu.roll (XLU) + one masked select per shifted operand -- no concatenate copies --
    and three accumulating MXU matmuls into one f32 result.
    """
    c, lt = x.shape
    halo = halo_ref[...]                                           # (C, 2)
    lane = jax.lax.broadcasted_iota(jnp.int32, (1, lt), 1)

    # x_prev[:, l] = x[:, l-1]; lane 0 patched with the left halo column.
    x_prev = jnp.where(lane == 0, halo[:, 0:1], pltpu.roll(x, 1, axis=1))
    # x_next[:, l] = x[:, l+1]; lane Lt-1 patched with the right halo column.
    # (positive shift lt-1 == rotate by -1, avoids negative-shift corner cases)
    x_next = jnp.where(lane == lt - 1, halo[:, 1:2], pltpu.roll(x, lt - 1, axis=1))

    acc = jnp.dot(w_ref[1], x, preferred_element_type=jnp.float32)
    acc = acc + jnp.dot(w_ref[0], x_prev, preferred_element_type=jnp.float32)
    acc = acc + jnp.dot(w_ref[2], x_next, preferred_element_type=jnp.float32)
    return acc                                                     # (C, Lt) f32


def _stats_kernel(x_ref, halo_ref, w_ref, stats_ref, shift_ref, s1_ref, s2_ref,
                  *, l_valid, l_tile):
    """Pass 1: per-batch-row shifted sum / sum-of-squares of conv(x).

    Accumulates in VMEM scratch over the L-tile axis (no per-step narrow output stores,
    no concatenates) and writes the (C, 3) = [shift, sum, sumsq] partial once per row.
    """
    t = pl.program_id(1)
    conv = _conv_tile(x_ref[...], halo_ref, w_ref)                 # (C, Lt) f32

    @pl.when(t == 0)
    def _():
        # Per-row shift ~= row mean (first tile): keeps the accumulated sums small so the
        # variance combine does not suffer E[x^2]-E[x]^2 cancellation.
        shift_ref[...] = jnp.mean(conv, axis=-1, keepdims=True)
        s1_ref[...] = jnp.zeros_like(s1_ref)
        s2_ref[...] = jnp.zeros_like(s2_ref)

    d = conv - shift_ref[...]
    if l_valid is not None:
        # Exclude padded columns (only the last tile can contain them).
        lane = jax.lax.broadcasted_iota(jnp.int32, (1, l_tile), 1)
        d = jnp.where(t * l_tile + lane < l_valid, d, 0.0)
    s1_ref[...] += jnp.sum(d, axis=-1, keepdims=True)
    s2_ref[...] += jnp.sum(d * d, axis=-1, keepdims=True)

    @pl.when(t == pl.num_programs(1) - 1)
    def _():
        stats_ref[:, 0:1] = shift_ref[...]
        stats_ref[:, 1:2] = s1_ref[...]
        stats_ref[:, 2:3] = s2_ref[...]


def _apply_kernel(x_ref, halo_ref, w_ref, st_ref, o_ref):
    """Pass 2: recompute conv tile, apply folded BN (one FMA) + ReLU + residual."""
    x = x_ref[...]
    conv = _conv_tile(x, halo_ref, w_ref)                          # (C, Lt) f32
    st = st_ref[...]                                               # (C, 2): [scale, offset]
    y = jnp.maximum(conv * st[:, 0:1] + st[:, 1:2], 0.0)
    o_ref[...] = (x.astype(jnp.float32) + y).astype(o_ref.dtype)


def _choose_l_tile(length, channels, *, max_tile=4096, target_tile_bytes=2 << 20):
    """Pick (l_tile, l_padded).

    l_tile is a multiple of 128 (or == length when a single tile fits), sized so a
    (C, l_tile) f32 tile stays around `target_tile_bytes`; when no aligned tile divides
    L exactly, L is padded up to a tile multiple (never a giant single-tile fallback).
    """
    cap = (target_tile_bytes // (channels * 4)) // 128 * 128
    cap = max(128, min(max_tile, cap))
    if length <= cap:
        return length, length
    best = None
    for t in range(cap, 127, -128):
        padded = -(-length // t) * t
        key = (padded - length, -t)            # least padding, then largest tile
        if best is None or key < best[0]:
            best = (key, t, padded)
    _, t, padded = best
    return t, padded


def scinet_block_1d(x, conv_w, conv_b, bn_gamma, bn_beta, eps=1e-5):
    del conv_b  # exactly cancelled by training-mode BatchNorm mean subtraction
    N, C, L = x.shape
    l_tile, l_pad = _choose_l_tile(L, C)
    T = l_pad // l_tile

    x_in = x if l_pad == L else jnp.pad(x, ((0, 0), (0, 0), (0, l_pad - L)))

    # Per-tap (C, C) weights stacked tap-major: [w_prev, w_mid, w_next].
    w_taps = jnp.transpose(conv_w, (2, 0, 1)).astype(x.dtype)      # (3, C, C)

    # Merged halo columns: halos[n, t, :, 0] = x[n, :, t*l_tile - 1] (0 at the left edge),
    #                      halos[n, t, :, 1] = x[n, :, (t+1)*l_tile] (0 past the right edge).
    x_cp = jnp.pad(x_in, ((0, 0), (0, 0), (1, 1)))
    left = x_cp[:, :, 0:T * l_tile:l_tile]                         # (N, C, T)
    right = x_cp[:, :, l_tile + 1::l_tile]                         # (N, C, T)
    halos = jnp.stack([left, right], axis=-1).transpose(0, 2, 1, 3).astype(x.dtype)  # (N,T,C,2)

    grid = (N, T)
    x_spec = pl.BlockSpec((None, C, l_tile), lambda n, t: (n, 0, t))
    halo_spec = pl.BlockSpec((None, None, C, 2), lambda n, t: (n, t, 0, 0))
    w_spec = pl.BlockSpec((3, C, C), lambda n, t: (0, 0, 0))       # constant block
    vmem_limit = 48 * 1024 * 1024  # safe on v7x (64 MiB physical); headroom on v5e/v6e

    # ---- Pass 1: per-batch-row shifted statistics (reduction only over the tile axis). ----
    stats = pl.pallas_call(
        functools.partial(_stats_kernel,
                          l_valid=None if l_pad == L else L,
                          l_tile=l_tile),
        out_shape=jax.ShapeDtypeStruct((N, C, 3), jnp.float32),
        grid=grid,
        in_specs=[x_spec, halo_spec, w_spec],
        out_specs=pl.BlockSpec((None, C, 3), lambda n, t: (n, 0, 0)),
        scratch_shapes=[pltpu.VMEM((C, 1), jnp.float32),
                        pltpu.VMEM((C, 1), jnp.float32),
                        pltpu.VMEM((C, 1), jnp.float32)],
        compiler_params=pltpu.CompilerParams(
            dimension_semantics=("parallel", "arbitrary"),
            vmem_limit_bytes=vmem_limit),
    )(x_in, halos, w_taps)

    # Tiny O(N*C) host-side fold: Chan-style combine of per-row (shift, sum, sumsq) partials,
    # then fold BN into a single per-channel scale/offset FMA.
    count_row = jnp.float32(L)
    shift = stats[:, :, 0]
    s1 = stats[:, :, 1]
    s2 = stats[:, :, 2]
    mean_row = shift + s1 / count_row                              # (N, C) exact row means
    m2_row = s2 - s1 * s1 / count_row                              # centered SS per row
    mean = jnp.mean(mean_row, axis=0)                              # (C,) global mean
    m2 = jnp.sum(m2_row, axis=0) + count_row * jnp.sum((mean_row - mean) ** 2, axis=0)
    var = jnp.maximum(m2 / jnp.float32(N * L), 0.0)                # biased (training-mode BN)
    inv = jax.lax.rsqrt(var + eps)
    g32 = bn_gamma.astype(jnp.float32)
    scale = g32 * inv
    offset = bn_beta.astype(jnp.float32) - mean * scale
    st = jnp.stack([scale, offset], axis=-1)                       # (C, 2)

    # ---- Pass 2: recompute conv, folded BN + ReLU + residual (independent tiles). ----
    out = pl.pallas_call(
        _apply_kernel,
        out_shape=jax.ShapeDtypeStruct((N, C, l_pad), x.dtype),
        grid=grid,
        in_specs=[x_spec, halo_spec, w_spec,
                  pl.BlockSpec((C, 2), lambda n, t: (0, 0))],
        out_specs=x_spec,
        compiler_params=pltpu.CompilerParams(
            dimension_semantics=("parallel", "parallel"),
            vmem_limit_bytes=vmem_limit),
    )(x_in, halos, w_taps, st)

    return out if l_pad == L else out[:, :, :L]


def _reference(x, conv_w, conv_b, bn_gamma, bn_beta, eps=1e-5):
    # Pure-JAX reference mirroring PyTorch semantics (conv bias INCLUDED here;
    # it cancels inside training-mode BN, which the kernel exploits).
    conv = jax.lax.conv_general_dilated(
        x, conv_w, window_strides=(1,), padding=((1, 1),),
        dimension_numbers=("NCH", "OIH", "NCH"),
    ) + conv_b.reshape(1, -1, 1)
    mean = jnp.mean(conv, axis=(0, 2), keepdims=True)
    var = jnp.mean((conv - mean) ** 2, axis=(0, 2), keepdims=True)
    normed = (conv - mean) / jnp.sqrt(var + eps)
    normed = normed * bn_gamma.reshape(1, -1, 1) + bn_beta.reshape(1, -1, 1)
    return x + jnp.maximum(normed, 0.0)


if __name__ == "__main__":
    # Small, lane-friendly demo shapes (batch=2, channels=8, length=128).
    N, C, L = 2, 8, 128
    key = jax.random.PRNGKey(0)
    kx, kw, kb = jax.random.split(key, 3)

    x = jax.random.normal(kx, (N, C, L), dtype=jnp.float32)
    # Deterministic synthetic parameters (Conv1d weight/bias shapes from __init__).
    fan_in = C * 3
    bound = 1.0 / np.sqrt(fan_in)
    conv_w = jax.random.uniform(kw, (C, C, 3), jnp.float32, -bound, bound)
    conv_b = jax.random.uniform(kb, (C,), jnp.float32, -bound, bound)
    bn_gamma = jnp.ones((C,), jnp.float32)   # BatchNorm1d default weight
    bn_beta = jnp.zeros((C,), jnp.float32)   # BatchNorm1d default bias

    out = scinet_block_1d(x, conv_w, conv_b, bn_gamma, bn_beta)
    out = jax.block_until_ready(out)

    ref = _reference(x, conv_w, conv_b, bn_gamma, bn_beta)
    np.testing.assert_allclose(np.asarray(out), np.asarray(ref), rtol=1e-4, atol=1e-5)

    print("KERNEL_OK")
</pallas_src>

<mosaic_0001>
module attributes {stable_mosaic.version = 11 : i64} {
  func.func @_stats_kernel(%arg0: i32, %arg1: i32, %arg2: memref<1x8x128xf32, #tpu.memory_space<vmem>>, %arg3: memref<1x1x8x2xf32, #tpu.memory_space<vmem>>, %arg4: memref<3x8x8xf32, #tpu.memory_space<vmem>>, %arg5: memref<1x8x3xf32, #tpu.memory_space<vmem>>, %arg6: memref<8x1xf32, #tpu.memory_space<vmem>>, %arg7: memref<8x1xf32, #tpu.memory_space<vmem>>, %arg8: memref<8x1xf32, #tpu.memory_space<vmem>>) attributes {dimension_semantics = [#tpu.dimension_semantics<parallel>, #tpu.dimension_semantics<arbitrary>], iteration_bounds = array<i64: 2, 1>, scalar_prefetch = 0 : i64, scratch_operands = 3 : i64, tpu.core_type = #tpu.core_type<tc>, window_params = [{transform_indices = @transform_0, window_bounds = array<i64: 1, 8, 128>}, {transform_indices = @transform_1, window_bounds = array<i64: 1, 1, 8, 2>}, {pipeline_mode = #tpu.pipeline_mode<synchronous>, transform_indices = @transform_2, window_bounds = array<i64: 3, 8, 8>}, {transform_indices = @transform_3, window_bounds = array<i64: 1, 8, 3>}]} {
    %c0 = arith.constant 0 : index
    %c0_0 = arith.constant 0 : index
    %c0_1 = arith.constant 0 : index
    %0 = vector.load %arg2[%c0, %c0_0, %c0_1] : memref<1x8x128xf32, #tpu.memory_space<vmem>>, vector<1x8x128xf32>
    %1 = vector.shape_cast %0 : vector<1x8x128xf32> to vector<8x128xf32>
    %c0_2 = arith.constant 0 : index
    %c0_3 = arith.constant 0 : index
    %c0_4 = arith.constant 0 : index
    %c0_5 = arith.constant 0 : index
    %2 = vector.load %arg3[%c0_2, %c0_3, %c0_4, %c0_5] : memref<1x1x8x2xf32, #tpu.memory_space<vmem>>, vector<1x1x8x2xf32>
    %3 = vector.shape_cast %2 : vector<1x1x8x2xf32> to vector<8x2xf32>
    %4 = tpu.iota {dimensions = array<i32: 1>} : vector<1x128xi32>
    %c0_i32 = arith.constant 0 : i32
    %5 = vector.broadcast %c0_i32 : i32 to vector<1x128xi32>
    %6 = arith.cmpi eq, %4, %5 : vector<1x128xi32>
    %7 = vector.extract_strided_slice %3 {offsets = [0, 0], sizes = [8, 1], strides = [1, 1]} : vector<8x2xf32> to vector<8x1xf32>
    %c1_i32 = arith.constant 1 : i32
    %8 = tpu.dynamic_rotate %1 by %c1_i32 dim 1 : vector<8x128xf32>, i32 -> vector<8x128xf32>
    %9 = vector.shape_cast %6 : vector<1x128xi1> to vector<1x128xi1>
    %10 = vector.broadcast %9 : vector<1x128xi1> to vector<8x128xi1>
    %11 = vector.shape_cast %7 : vector<8x1xf32> to vector<8x1xf32>
    %12 = vector.broadcast %11 : vector<8x1xf32> to vector<8x128xf32>
    %13 = arith.select %10, %12, %8 : vector<8x128xi1>, vector<8x128xf32>
    %c127_i32 = arith.constant 127 : i32
    %14 = vector.broadcast %c127_i32 : i32 to vector<1x128xi32>
    %15 = arith.cmpi eq, %4, %14 : vector<1x128xi32>
    %16 = vector.extract_strided_slice %3 {offsets = [0, 1], sizes = [8, 1], strides = [1, 1]} : vector<8x2xf32> to vector<8x1xf32>
    %c127_i32_6 = arith.constant 127 : i32
    %17 = tpu.dynamic_rotate %1 by %c127_i32_6 dim 1 : vector<8x128xf32>, i32 -> vector<8x128xf32>
    %18 = vector.shape_cast %15 : vector<1x128xi1> to vector<1x128xi1>
    %19 = vector.broadcast %18 : vector<1x128xi1> to vector<8x128xi1>
    %20 = vector.shape_cast %16 : vector<8x1xf32> to vector<8x1xf32>
    %21 = vector.broadcast %20 : vector<8x1xf32> to vector<8x128xf32>
    %22 = arith.select %19, %21, %17 : vector<8x128xi1>, vector<8x128xf32>
    %c1 = arith.constant 1 : index
    %c0_7 = arith.constant 0 : index
    %c0_8 = arith.constant 0 : index
    %23 = vector.load %arg4[%c1, %c0_7, %c0_8] : memref<3x8x8xf32, #tpu.memory_space<vmem>>, vector<1x8x8xf32>
    %24 = vector.shape_cast %23 : vector<1x8x8xf32> to vector<8x8xf32>
    %cst = arith.constant dense<0.000000e+00> : vector<8x128xf32>
    %25 = tpu.matmul %24, %1, %cst {dimension_numbers = #tpu.dot_dimension_numbers<[1], [0], [0], [1], [0, 0, 1, 1], [], []>} : vector<8x8xf32>, vector<8x128xf32>, vector<8x128xf32> -> vector<8x128xf32>
    %c0_9 = arith.constant 0 : index
    %c0_10 = arith.constant 0 : index
    %c0_11 = arith.constant 0 : index
    %26 = vector.load %arg4[%c0_9, %c0_10, %c0_11] : memref<3x8x8xf32, #tpu.memory_space<vmem>>, vector<1x8x8xf32>
    %27 = vector.shape_cast %26 : vector<1x8x8xf32> to vector<8x8xf32>
    %cst_12 = arith.constant dense<0.000000e+00> : vector<8x128xf32>
    %28 = tpu.matmul %27, %13, %cst_12 {dimension_numbers = #tpu.dot_dimension_numbers<[1], [0], [0], [1], [0, 0, 1, 1], [], []>} : vector<8x8xf32>, vector<8x128xf32>, vector<8x128xf32> -> vector<8x128xf32>
    %29 = arith.addf %25, %28 : vector<8x128xf32>
    %c2 = arith.constant 2 : index
    %c0_13 = arith.constant 0 : index
    %c0_14 = arith.constant 0 : index
    %30 = vector.load %arg4[%c2, %c0_13, %c0_14] : memref<3x8x8xf32, #tpu.memory_space<vmem>>, vector<1x8x8xf32>
    %31 = vector.shape_cast %30 : vector<1x8x8xf32> to vector<8x8xf32>
    %cst_15 = arith.constant dense<0.000000e+00> : vector<8x128xf32>
    %32 = tpu.matmul %31, %22, %cst_15 {dimension_numbers = #tpu.dot_dimension_numbers<[1], [0], [0], [1], [0, 0, 1, 1], [], []>} : vector<8x8xf32>, vector<8x128xf32>, vector<8x128xf32> -> vector<8x128xf32>
    %33 = arith.addf %29, %32 : vector<8x128xf32>
    %c0_i32_16 = arith.constant 0 : i32
    %34 = arith.cmpi eq, %arg1, %c0_i32_16 : i32
    %35 = arith.extui %34 : i1 to i32
    %c0_i32_17 = arith.constant 0 : i32
    %36 = arith.cmpi ne, %35, %c0_i32_17 : i32
    scf.if %36 {
      %cst_32 = arith.constant dense<0.000000e+00> : vector<8xf32>
      %54 = vector.multi_reduction <add>, %33, %cst_32 [1] : vector<8x128xf32> to vector<8xf32>
      %55 = vector.shape_cast %54 : vector<8xf32> to vector<8x1xf32>
      %cst_33 = arith.constant 1.280000e+02 : f32
      %56 = vector.broadcast %cst_33 : f32 to vector<8x1xf32>
      %57 = arith.divf %55, %56 : vector<8x1xf32>
      %c0_34 = arith.constant 0 : index
      %c0_35 = arith.constant 0 : index
      %58 = vector.load %arg6[%c0_34, %c0_35] : memref<8x1xf32, #tpu.memory_space<vmem>>, vector<8x1xf32>
      tpu.vector_store %arg6[%c0_34, %c0_35], %57 {strides = array<i32>} : memref<8x1xf32, #tpu.memory_space<vmem>>, vector<8x1xf32>,
      %cst_36 = arith.constant 0.000000e+00 : f32
      %59 = vector.broadcast %cst_36 : f32 to vector<8x1xf32>
      %c0_37 = arith.constant 0 : index
      %c0_38 = arith.constant 0 : index
      %60 = vector.load %arg7[%c0_37, %c0_38] : memref<8x1xf32, #tpu.memory_space<vmem>>, vector<8x1xf32>
      tpu.vector_store %arg7[%c0_37, %c0_38], %59 {strides = array<i32>} : memref<8x1xf32, #tpu.memory_space<vmem>>, vector<8x1xf32>,
      %cst_39 = arith.constant 0.000000e+00 : f32
      %61 = vector.broadcast %cst_39 : f32 to vector<8x1xf32>
      %c0_40 = arith.constant 0 : index
      %c0_41 = arith.constant 0 : index
      %62 = vector.load %arg8[%c0_40, %c0_41] : memref<8x1xf32, #tpu.memory_space<vmem>>, vector<8x1xf32>
      tpu.vector_store %arg8[%c0_40, %c0_41], %61 {strides = array<i32>} : memref<8x1xf32, #tpu.memory_space<vmem>>, vector<8x1xf32>,
    } else {
    }
    %c0_18 = arith.constant 0 : index
    %c0_19 = arith.constant 0 : index
    %37 = vector.load %arg6[%c0_18, %c0_19] : memref<8x1xf32, #tpu.memory_space<vmem>>, vector<8x1xf32>
    %38 = vector.broadcast %37 : vector<8x1xf32> to vector<8x128xf32>
    %39 = arith.subf %33, %38 : vector<8x128xf32>
    %c0_20 = arith.constant 0 : index
    %c0_21 = arith.constant 0 : index
    %40 = vector.load %arg7[%c0_20, %c0_21] : memref<8x1xf32, #tpu.memory_space<vmem>>, vector<8x1xf32>
    %cst_22 = arith.constant dense<0.000000e+00> : vector<8xf32>
    %41 = vector.multi_reduction <add>, %39, %cst_22 [1] : vector<8x128xf32> to vector<8xf32>
    %42 = vector.shape_cast %41 : vector<8xf32> to vector<8x1xf32>
    %43 = arith.addf %40, %42 : vector<8x1xf32>
    %c0_23 = arith.constant 0 : index
    %c0_24 = arith.constant 0 : index
    %44 = vector.load %arg7[%c0_23, %c0_24] : memref<8x1xf32, #tpu.memory_space<vmem>>, vector<8x1xf32>
    tpu.vector_store %arg7[%c0_23, %c0_24], %43 {strides = array<i32>} : memref<8x1xf32, #tpu.memory_space<vmem>>, vector<8x1xf32>,
    %c0_25 = arith.constant 0 : index
    %c0_26 = arith.constant 0 : index
    %45 = vector.load %arg8[%c0_25, %c0_26] : memref<8x1xf32, #tpu.memory_space<vmem>>, vector<8x1xf32>
    %46 = arith.mulf %39, %39 : vector<8x128xf32>
    %cst_27 = arith.constant dense<0.000000e+00> : vector<8xf32>
    %47 = vector.multi_reduction <add>, %46, %cst_27 [1] : vector<8x128xf32> to vector<8xf32>
    %48 = vector.shape_cast %47 : vector<8xf32> to vector<8x1xf32>
    %49 = arith.addf %45, %48 : vector<8x1xf32>
    %c0_28 = arith.constant 0 : index
    %c0_29 = arith.constant 0 : index
    %50 = vector.load %arg8[%c0_28, %c0_29] : memref<8x1xf32, #tpu.memory_space<vmem>>, vector<8x1xf32>
    tpu.vector_store %arg8[%c0_28, %c0_29], %49 {strides = array<i32>} : memref<8x1xf32, #tpu.memory_space<vmem>>, vector<8x1xf32>,
    %c0_i32_30 = arith.constant 0 : i32
    %51 = arith.cmpi eq, %arg1, %c0_i32_30 : i32
    %52 = arith.extui %51 : i1 to i32
    %c0_i32_31 = arith.constant 0 : i32
    %53 = arith.cmpi ne, %52, %c0_i32_31 : i32
    scf.if %53 {
      %c0_32 = arith.constant 0 : index
      %c0_33 = arith.constant 0 : index
      %54 = vector.load %arg6[%c0_32, %c0_33] : memref<8x1xf32, #tpu.memory_space<vmem>>, vector<8x1xf32>
      %c0_34 = arith.constant 0 : index
      %c0_35 = arith.constant 0 : index
      %c0_36 = arith.constant 0 : index
      %55 = vector.load %arg5[%c0_34, %c0_35, %c0_36] : memref<1x8x3xf32, #tpu.memory_space<vmem>>, vector<1x8x1xf32>
      %56 = vector.shape_cast %55 : vector<1x8x1xf32> to vector<8x1xf32>
      %57 = vector.shape_cast %54 : vector<8x1xf32> to vector<1x8x1xf32>
      tpu.vector_store %arg5[%c0_34, %c0_35, %c0_36], %57 {strides = array<i32>} : memref<1x8x3xf32, #tpu.memory_space<vmem>>, vector<1x8x1xf32>,
      %c0_37 = arith.constant 0 : index
      %c0_38 = arith.constant 0 : index
      %58 = vector.load %arg7[%c0_37, %c0_38] : memref<8x1xf32, #tpu.memory_space<vmem>>, vector<8x1xf32>
      %c0_39 = arith.constant 0 : index
      %c0_40 = arith.constant 0 : index
      %c1_41 = arith.constant 1 : index
      %59 = vector.load %arg5[%c0_39, %c0_40, %c1_41] : memref<1x8x3xf32, #tpu.memory_space<vmem>>, vector<1x8x1xf32>
      %60 = vector.shape_cast %59 : vector<1x8x1xf32> to vector<8x1xf32>
      %61 = vector.shape_cast %58 : vector<8x1xf32> to vector<1x8x1xf32>
      tpu.vector_store %arg5[%c0_39, %c0_40, %c1_41], %61 {strides = array<i32>} : memref<1x8x3xf32, #tpu.memory_space<vmem>>, vector<1x8x1xf32>,
      %c0_42 = arith.constant 0 : index
      %c0_43 = arith.constant 0 : index
      %62 = vector.load %arg8[%c0_42, %c0_43] : memref<8x1xf32, #tpu.memory_space<vmem>>, vector<8x1xf32>
      %c0_44 = arith.constant 0 : index
      %c0_45 = arith.constant 0 : index
      %c2_46 = arith.constant 2 : index
      %63 = vector.load %arg5[%c0_44, %c0_45, %c2_46] : memref<1x8x3xf32, #tpu.memory_space<vmem>>, vector<1x8x1xf32>
      %64 = vector.shape_cast %63 : vector<1x8x1xf32> to vector<8x1xf32>
      %65 = vector.shape_cast %62 : vector<8x1xf32> to vector<1x8x1xf32>
      tpu.vector_store %arg5[%c0_44, %c0_45, %c2_46], %65 {strides = array<i32>} : memref<1x8x3xf32, #tpu.memory_space<vmem>>, vector<1x8x1xf32>,
    } else {
    }
    return
  }
  func.func @transform_0(%arg0: i32, %arg1: i32) -> (i32, i32, i32) {
    %c0_i32 = arith.constant 0 : i32
    %c0_i32_0 = arith.constant 0 : i32
    return %arg0, %c0_i32, %arg1 : i32, i32, i32
  }
  func.func @transform_1(%arg0: i32, %arg1: i32) -> (i32, i32, i32, i32) {
    %c0_i32 = arith.constant 0 : i32
    %c0_i32_0 = arith.constant 0 : i32
    %c0_i32_1 = arith.constant 0 : i32
    return %arg0, %arg1, %c0_i32, %c0_i32_0 : i32, i32, i32, i32
  }
  func.func @transform_2(%arg0: i32, %arg1: i32) -> (i32, i32, i32) {
    %c0_i32 = arith.constant 0 : i32
    %c0_i32_0 = arith.constant 0 : i32
    %c0_i32_1 = arith.constant 0 : i32
    %c0_i32_2 = arith.constant 0 : i32
    return %c0_i32, %c0_i32_0, %c0_i32_1 : i32, i32, i32
  }
  func.func @transform_3(%arg0: i32, %arg1: i32) -> (i32, i32, i32) {
    %c0_i32 = arith.constant 0 : i32
    %c0_i32_0 = arith.constant 0 : i32
    %c0_i32_1 = arith.constant 0 : i32
    return %arg0, %c0_i32, %c0_i32_0 : i32, i32, i32
  }
}

</mosaic_0001>

<bundles_post_ra>
// kernel: tpu_custom_call.1
= control target key start
LH: loop header
LB: loop body
LE: loop exit
PB: predicated region body
PF: predicated region fallthrough
CT: control target
= control target key end

     0   :  { %8 = vsyncpa [#allocation6], 0  ;;  %s993_s0 = inlined_call_operand.hbm [shape: f32[2,8,128], index: 0, kind: input, shape index: {}]   ;;  %s994_s1 = inlined_call_operand.vmem [shape: f32[2,1,8,2], index: 1, kind: input, shape index: {}]   ;;  %s995_s2 = inlined_call_operand.vmem [shape: f32[3,8,8], index: 2, kind: input, shape index: {}]   ;;  %s996_s3 = inlined_call_operand.vmem [shape: f32[2,8,3], index: 3, kind: output, shape index: {}]  }
   0x1   :  { %10 = vsyncpa [#allocation6 + $0x1], 0  ;;  %s835_s12 = smov 0   ;;  %s837_s13 = smov 0  }
   0x2   :  { %s839_s14 = smov 0   ;;  %s841_s15 = smov 0  }
   0x3   :  { %s843_s16 = smov 0   ;;  %s845_s17 = smov 0  }
   0x4 LB: > { %s619_s18 = sadd.s32 4294967295, %s805_s17   ;;  %s28_s19 = sadd.s32 1, %s801_s16  ;;  %s805_s17 = sphi %s845_s17, %s16_s17   ;;  %s801_s16 = sphi %s843_s16, %s1006_s16   ;;  %s797_s15 = sphi %s841_s15, %s1005_s15   ;;  %s793_s14 = sphi %s839_s14, %s1004_s14   ;;  %s789_s13 = sphi %s837_s13, %s1003_s13   ;;  %s785_s12 = sphi %s835_s12, %s1002_s12  }
   0x5   : > { %p30_p0 = scmp.ge.s32.totalorder %s28_s19, 2  ;;  %s37_s20 = sadd.s32 1, %s793_s14 }
   0x6   : > { %p44_p1 = scmp.ne.s32.totalorder %s793_s14, %s789_s13  ;;  %p45_p2 = scmp.eq.s32.totalorder %s805_s17, 0 }
   0x7   : > { %s1008_s19 = smov (%p30_p0, %s28_s19), 0  ;;  %p50_p4 = scmp.ne.s32.totalorder %s789_s13, %s785_s12 }
   0x8   : > { %p871_p3 = por %p45_p2, %p44_p1  ;;  %s32_s22 = ssub.s32 %s801_s16, %s1008_s19 }
   0x9   : > { %p51_p5 = scmp.eq.s32.totalorder %s619_s18, 0  ;;  %p35_p6 = scmp.eq.s32.totalorder %s32_s22, 0 }
   0xa   : > { %p666_p8 = scmp.lt.s32.totalorder %s805_s17, 2  ;;  %s152_s25 = sand.u32 1, %s793_s14  }
   0xb   : > { %p878_p7 = por %p51_p5, %p50_p4  ;;  %s624_s26 = sshll.u32 %s801_s16, 7 }
   0xc   : > { %s884_s24 = scalar_select %p35_p6, %s793_s14, %s37_s20  }
   0xd   : > { %s623_s27 = sshll.u32 %s152_s25, 3  ;;  %s891_s30 = scalar_lea.hbm %s993_s0, %s624_s26 }
   0xe   : > { %s156_s4 = scalar_lea.vmem [#allocation5], %s623_s27  ;;  %p895_p9 = pnand %p666_p8, %p871_p3 }
   0xf   : > { %s164_s5 = sshll.u32 %s156_s4, 4  ;;  %s153_s7 = scalar_lea.sflag [#allocation6], %s152_s25  ;;  %s899_s5 = int_to_ptr.vmem [resolvable:$true] %s164_s5 }
  0x10   : > { %s725_s8 = scalar_lea.hbm %s891_s30, 128  ;;  %p727_p13 = pneg %p895_p9 }
  0x11   : > { %p726_p12 = scmp.ne.s32.totalorder %s891_s30, %s725_s8  ;;  %s730_s11 = scalar_lea.hbm %s993_s0, 256 }
  0x12   : > { %p731_p2 = scmp.lt.u32.totalorder %s891_s30, %s993_s0  ;;  %p732_p3 = scmp.lt.u32.totalorder %s730_s11, %s725_s8 }
  0x13   : > { %p728_p0 = pnand %p727_p13, %p726_p12  ;;  %p734_p5 = scmp.lt.u32.totalorder %s725_s8, %s891_s30 }
  0x14   : > { %p733_p4 = por %p732_p3, %p731_p2 }
  0x15   : > { %p729_p1 = pneg %p728_p0 }
  0x16   : > { %p735_p6 = por %p734_p5, %p733_p4 }
  0x18   : > { %p736_p8 = pnand %p735_p6, %p729_p1 }
  0x1a   : > { %739 = shalt.err (!%p736_p8)
}
  0x1b   : > { %s740_s20 = scalar_lea.vmem %s899_s5, 128  ;;  %s807_s21 = smov [#allocation5]  }
  0x1c   : > { %p741_p12 = scmp.ne.s32.totalorder %s899_s5, %s740_s20  ;;  %s745_s22 = sshll.u32 %s807_s21, 4  ;;  %s746_s22 = int_to_ptr.vmem [resolvable:$false] %s745_s22 }
  0x1d   : > { %s747_s25 = scalar_lea.vmem %s746_s22, 256  ;;  %p748_p11 = scmp.lt.s32.totalorder %s899_s5, %s746_s22 }
  0x1e   : > { %p743_p0 = pnand %p741_p12, %p727_p13  ;;  %p749_p2 = scmp.lt.s32.totalorder %s747_s25, %s740_s20 }
  0x20   : > { %p744_p10 = pneg %p743_p0  ;;  %p750_p3 = por %p749_p2, %p748_p11 }
  0x22   : > { %p751_p4 = pnand %p750_p3, %p744_p10 }
  0x24   : > { %754 = shalt.err (!%p751_p4)
}
  0x25   : > { %665 = dma.hbm_to_vmem [thread:$0]  (!%p895_p9), %s891_s30, 128, %s899_s5, %s153_s7  }
  0x26   : > { %p1000_p1 = scmp.lt.s32.totalorder %s805_s17, 3  ;;  %p1001_p5 = scmp.ge.s32.totalorder %s805_s17, 1 }
  0x28   : > { %p180_p13 = pnand %p1001_p5, %p1000_p1 }
  0x29   : > { %s185_s26 = sand.u32 (!%p180_p13), 1, %s789_s13  }
  0x2a   : > { %183 = sbr.rel (%p180_p13) target bundleno = 957 (0x3bd), region = 32  ;;  %s626_s27 = sshll.u32 (!%p180_p13), %s185_s26, 3 }
  0x2b   : > { %s186_s28 = scalar_lea.sflag (!%p180_p13), [#allocation6], %s185_s26  ;;  %s189_s29 = scalar_lea.vmem (!%p180_p13), [#allocation5], %s626_s27 }
  0x31   : > { %780 = dma.done.wait (%p878_p7), %s186_s28, 128  }
  0x32   : > { %782 = vsyncadd (%p878_p7), %s186_s28, 4294967168  ;;  %p218_p10 = scmp.lt.s32.totalorder %s797_s15, 1  ;;  %v808_v0 = vmov 0   ;;  %v809_v1 = vmov 0.0   ;;  %vm810_vm0 = vmmov 0   ;;  %v229_v3 = vld [vmem:[%s189_s29] sm:$0xff]  ;;  %v231_v6 = vlaneseq }
  0x33   : > { %722 = vset.pattern.permute.xlu0 %v808_v0  ;;  %647 = vmatprep.subr.mxu0 %v809_v1  ;;  %v629_v4 = vld [vmem:[%s995_s2 + $0x8] sm:$0xff]  ;;  %vm257_vm1 = vcmask 64512   ;;  %s811_s8 = smov 1   ;;  %v812_v5 = vmov 1   ;;  %s813_s9 = smov 127   ;;  %v256_v10 = vld [vmem:[%s995_s2] sm:$0xff] }
  0x34   : > { %s1010_s15 = smov (!%p218_p10, %s797_s15), 1  ;;  %649 = vmatprep.mubr.msk.f32.mxu0 %vm810_vm0, %v809_v1  ;;  %642 = vmatprep.subr.mxu1 %v809_v1  ;;  %v232_v7 = vand.u32 127, %v231_v6  ;;  %v632_v14 = vld [vmem:[%s995_s2 + $0x10] sm:$0xff]  ;;  %vm488_vm4 = vcmask 7168   ;;  %vm521_vm5 = vcmask 15368   ;;  %vm528_vm6 = vcmask 23568  }
  0x35   : > { %644 = vmatprep.mubr.msk.f32.mxu1 %vm810_vm0, %v809_v1  ;;  %s627_s30 = sshll.u32 %s1010_s15, 3  ;;  %234 = vrot.lane.b32.xlu1 %v229_v3, %s811_s8  ;;  %490 = vst.msk [vmem:[#allocation3] sm:$0xff] %vm488_vm4, %v809_v1  ;;  %491 = vst.msk [vmem:[#allocation4] sm:$0xff] %vm488_vm4, %v809_v1  ;;  %s814_s15 = smov 2  }
  0x36   : > { %s224_s5 = scalar_lea.vmem %s994_s1, %s627_s30  ;;  %648 = vmatpush3.msra.mxu0 %v229_v3  ;;  %vm233_vm2 = vcmp.eq.s32.totalorder %v232_v7, 0  ;;  %vm244_vm3 = vcmp.eq.s32.totalorder %v232_v7, 127  ;;  %s228_s22 = scalar_lea.vmem %s996_s3, %s627_s30 }
  0x37   : > { %v230_v2 = vld [vmem:[%s224_s5] sm:$0xff]  ;;  %650 = vmatmul.mubr.msk.f32.vlgmr.msra.gmra.mrb[0].mxu0 %vm257_vm1, %v629_v4  ;;  %652 = vmatprep.subr.mxu0 %v809_v1 }
  0x38   : > { %240 = vperm.xlu0 %722, %v230_v2   ;;  %654 = vmatprep.mubr.msk.f32.mxu0 %vm810_vm0, %v809_v1 }
  0x39   : > { %245 = vrot.lane.b32.xlu1 %v229_v3, %s813_s9 }
  0x3c   : > { %723 = vset.pattern.permute.xlu0 %v812_v5  ;;  %v499_v27 = vld [vmem:[#allocation3] sm:$0xff]  ;;  %v505_v29 = vld [vmem:[#allocation4] sm:$0xff] }
  0x3d   : > { %250 = vperm.xlu0 %723, %v230_v2  }
  0x41   : > { %724 = vset.pattern.permute.xlu0 %v808_v0 }
  0xa7   : > { %v235_v8 = vpop.permute.xlu1 %234 }
  0xab   : > { %v246_v12 = vpop.permute.xlu1 %245 }
  0xb7   : > { %v241_v9 = vpop.permute.xlu0 %240 }
  0xb8   : > { %v243_v11 = vsel %vm233_vm2, %v241_v9, %v235_v8 }
  0xb9   : > { %643 = vmatpush3.msra.mxu1 %v243_v11 }
  0xba   : > { %645 = vmatmul.mubr.msk.f32.vlgmr.msra.gmra.mrb[0].mxu1 %vm257_vm1, %v256_v10 }
  0xbc   : > { %v251_v13 = vpop.permute.xlu0 %250 }
  0xbd   : > { %v253_v15 = vsel %vm244_vm3, %v251_v13, %v246_v12 }
  0xbe   : > { %653 = vmatpush3.msra.mxu0 %v253_v15 }
  0xbf   : > { %655 = vmatmul.mubr.msk.f32.vlgmr.msra.gmra.mrb[0].mxu0 %vm257_vm1, %v632_v14 }
 0x18d   : > { %v327_v16 = vpop.f32.mrb[0].mxu1 }
 0x18e   : > { %v646_v17 = vpop.f32.mrb[1].mxu1 }
 0x192   : > { %v475_v18 = vpop.f32.mrb[0].mxu0 }
 0x193   : > { %v657_v19 = vadd.f32 %v475_v18, %v327_v16  ;;  %v656_v20 = vpop.f32.mrb[1].mxu0 }
 0x195   : > { %484 = vadd.xlane.f32.xlu1 %v657_v19 }
 0x222   : > { %v485_v21 = vpop.xlane.xlu1 %484 }
 0x223   : > { %v487_v22 = vmul.f32 0.0078125, %v485_v21 }
 0x225   : > { %489 = vst.msk [vmem:[#allocation2] sm:$0xff] %vm488_vm4, %v487_v22 }
 0x22c   : > { %v492_v23 = vld [vmem:[#allocation2] sm:$0xff] }
 0x22d   : > { %495 = vperm.xlu0 %724, %v492_v23   ;;  %515 = vst.msk [vmem:[%s228_s22] sm:$0xff] %vm488_vm4, %v492_v23 }
 0x2ac   : > { %v496_v24 = vpop.permute.xlu0 %495 }
 0x2ad   : > { %v498_v25 = vsub.f32 %v657_v19, %v496_v24 }
 0x2af   : > { %500 = vadd.xlane.f32.xlu0 %v498_v25  ;;  %v506_v26 = vmul.f32 %v498_v25, %v498_v25 }
 0x2b1   : > { %507 = vadd.xlane.f32.xlu1 %v506_v26 }
 0x33c   : > { %v501_v28 = vpop.xlane.xlu0 %500 }
 0x33d   : > { %v502_v30 = vadd.f32 %v501_v28, %v499_v27 }
 0x33e   : > { %v508_v31 = vpop.xlane.xlu1 %507 }
 0x33f   : > { %504 = vst.msk [vmem:[#allocation3] sm:$0xff] %vm488_vm4, %v502_v30  ;;  %v509_v32 = vadd.f32 %v508_v31, %v505_v29 }
 0x341   : > { %510 = vst.msk [vmem:[#allocation4] sm:$0xff] %vm488_vm4, %v509_v32 }
 0x346   : > { %v516_v33 = vld [vmem:[#allocation3] sm:$0xff] }
 0x347   : > { %518 = vrot.lane.b32.xlu1 %v516_v33, %s811_s8 }
 0x348   : > { %v523_v34 = vld [vmem:[#allocation4] sm:$0xff] }
 0x349   : > { %525 = vrot.lane.b32.xlu0 %v523_v34, %s814_s15 }
 0x3b9   : > { %v519_v35 = vpop.permute.xlu1 %518 }
 0x3ba   : > { %522 = vst.msk [vmem:[%s228_s22] sm:$0xff] %vm521_vm5, %v519_v35 }
 0x3bb   : > { %v526_v36 = vpop.permute.xlu0 %525 }
 0x3bc   : > { %529 = vst.msk [vmem:[%s228_s22] sm:$0xff] %vm528_vm6, %v526_v36 }
 0x3bd PF: > { %s16_s17 = sadd.s32 1, %s805_s17   ;;  %s1002_s12 = smov %s789_s13 }
 0x3be   : > { %p13_p7 = scmp.ge.s32.totalorder %s16_s17, 4   ;;  %s1003_s13 = smov %s793_s14 }
 0x3bf   : > { %s1004_s14 = smov %s884_s24  ;;  %s1005_s15 = smov %s801_s16 }
 0x3c0   : > { %s1006_s16 = smov %s1008_s19  ;;  %15 = sbr.rel (!%p13_p7) target bundleno = 4 (0x4), region = 85 }
 0x3c7   :  { %549 = vsyncpa [#allocation6], 1 }
 0x3c8   :  { %551 = vsyncpa [#allocation6 + $0x1], 1 }

</bundles_post_ra>
